<compile_context>
chip_gen: v6e
topology: v6e:2x2x1
jax: 0.10.0
libtpu: 0.0.40
codegen_flags: <defaults>
</compile_context>

<pallas_src>
import functools
import math

import jax
import jax.numpy as jnp
from jax import lax
from jax.experimental import pallas as pl
from jax.experimental.pallas import tpu as pltpu


NEG_INF = -1e30  # same constant PyTorch mask_logits uses


def _refined_reciprocal(x):
    """EUP approximate reciprocal + one Newton step (~f32 accuracy, off-VALU)."""
    r = pl.reciprocal(x, approx=True)
    return r * (2.0 - x * r)


def _cq_attention_kernel(c_len_ref, q_len_ref, c_ref, q_ref, w_ref, bias_ref,
                         o_ref, *, D, mxu_dtype):
    """One batch element per grid step.

    c_len_ref : (B,) SMEM   scalar-prefetched context valid lengths
    q_len_ref : (B,) SMEM   scalar-prefetched query valid lengths
    c_ref     : (1, D, Lc)  context, NCL (channel-major) layout
    q_ref     : (1, D, Lq)  query,   NCL layout
    w_ref     : (D, 3)      columns = [w4C, w4Q, w4mlu] (single fused operand)
    bias_ref  : (1,) SMEM   scalar bias
    o_ref     : (1, 4D, Lc) output, NCL: [C ; A ; C*A ; C*B] along channels
    """
    f32 = jnp.float32
    b = pl.program_id(0)

    c_ncl = c_ref[0]                          # (D, Lc) — stays transpose-free
    q_ncl = q_ref[0]                          # (D, Lq)
    Lc = c_ncl.shape[1]
    Lq = q_ncl.shape[1]
    bias = bias_ref[0]

    w4c = w_ref[:, 0:1]                       # (D, 1) columns
    w4q = w_ref[:, 1:2]                       # (D, 1)
    w4mlu = w_ref[:, 2:3]                     # (D, 1)

    # Additive masks built in-kernel from scalar-prefetched lengths: no mask
    # DMAs / pipeline buffers, and each lands directly in the layout S^T needs
    # ((Lq, 1) sublane column and (1, Lc) lane-dense row).
    c_len = c_len_ref[b]
    q_len = q_len_ref[b]
    lane_iota = lax.broadcasted_iota(jnp.int32, (1, Lc), 1)
    sub_iota = lax.broadcasted_iota(jnp.int32, (Lq, 1), 0)
    cmask_add = jnp.where(lane_iota < c_len, 0.0, NEG_INF).astype(f32)   # (1, Lc)
    qmask_add = jnp.where(sub_iota < q_len, 0.0, NEG_INF).astype(f32)    # (Lq, 1)

    # MXU dtype / precision policy: bf16 operands with f32 accumulation by
    # default; the f32 path requests HIGHEST precision so it tracks the exact
    # reference closely.  Softmax math is always f32.
    dot_kwargs = dict(preferred_element_type=f32)
    if jnp.dtype(mxu_dtype) == jnp.dtype(jnp.float32):
        dot_kwargs["precision"] = lax.Precision.HIGHEST

    # --- trilinear scores, computed transposed: S^T (Lq, Lc), Lc on lanes -----
    # M[:, j] = Q[:, j] * w4mlu + w4C fuses subres0 (C @ w4C) into the single
    # D-contraction below: (M ⋅_D C)[j, i] = (C[i]*w4mlu)·Q[j] + C[i]·w4C.
    m_mat = (q_ncl * w4mlu + w4c).astype(mxu_dtype)                      # (D, Lq) VPU
    c_mxu = c_ncl.astype(mxu_dtype)
    s_t = lax.dot_general(m_mat, c_mxu, (((0,), (0,)), ((), ())),
                          **dot_kwargs)                                  # (Lq, Lc)
    # subres1 per query: Q·w4Q -> (Lq, 1) column (tiny matvec, kept f32).
    s1 = lax.dot_general(q_ncl, w4q, (((0,), (0,)), ((), ())),
                         **dot_kwargs)                                   # (Lq, 1)

    # --- softmaxes (f32), both on the lane-dense transposed layout ------------
    # S1: softmax over the query axis (= sublane axis 0 of S^T).  subres1, bias
    # and the query mask are folded into one (Lq, 1) vector -> a single
    # full-matrix broadcast add.
    l1 = s_t + (s1 + bias + qmask_add)                                   # (Lq, Lc)
    e1 = jnp.exp(l1 - jnp.max(l1, axis=0, keepdims=True))
    attn1_t = e1 * _refined_reciprocal(jnp.sum(e1, axis=0, keepdims=True))

    # S2: softmax over the context axis (= lane axis 1 of S^T).  subres1 + bias
    # are constant along that axis, so softmax shift-invariance lets us drop
    # them exactly; only the (1, Lc) context mask is broadcast-added.
    l2 = s_t + cmask_add                                                 # (Lq, Lc)
    e2 = jnp.exp(l2 - jnp.max(l2, axis=1, keepdims=True))
    attn2_t = e2 * _refined_reciprocal(jnp.sum(e2, axis=1, keepdims=True))

    # --- attention outputs, produced directly in (D, Lc) NCL layout -----------
    a1_mxu = attn1_t.astype(mxu_dtype)
    # A^T = Q_ncl @ S1^T                                  -> (D, Lc)
    a_t = lax.dot_general(q_ncl.astype(mxu_dtype), a1_mxu,
                          (((1,), (0,)), ((), ())), **dot_kwargs)
    # T = S1 @ S2^T  (contract the shared Lq axis)        -> (Lc, Lc)
    t_mat = lax.dot_general(a1_mxu, attn2_t.astype(mxu_dtype),
                            (((0,), (0,)), ((), ())), **dot_kwargs)
    # B^T = C_ncl @ T^T                                   -> (D, Lc)
    b_t = lax.dot_general(c_mxu, t_mat.astype(mxu_dtype),
                          (((1,), (1,)), ((), ())), **dot_kwargs)

    # Direct slice stores into the NCL output (no concatenate, no transpose).
    dt = o_ref.dtype
    o_ref[0, 0 * D:1 * D, :] = c_ncl.astype(dt)
    o_ref[0, 1 * D:2 * D, :] = a_t.astype(dt)
    o_ref[0, 2 * D:3 * D, :] = (c_ncl * a_t).astype(dt)
    o_ref[0, 3 * D:4 * D, :] = (c_ncl * b_t).astype(dt)


def cq_attention_pallas(C_ncl, Q_ncl, Cmask, Qmask, w4C, w4Q, w4mlu, bias, *,
                        mxu_dtype=jnp.bfloat16):
    """C_ncl: [B, D, Lc] f32, Q_ncl: [B, D, Lq] f32 (NCL, as in the PyTorch call),
       Cmask: [B, Lc], Qmask: [B, Lq] (1 keep / 0 masked padding masks),
       w4C: [D,1], w4Q: [D,1], w4mlu: [1,1,D], bias: [1].
       Returns [B, 4D, Lc] f32 (NCL), matching CQAttention.forward (eval mode)."""
    B, D, Lc = C_ncl.shape
    Lq = Q_ncl.shape[2]

    # Scalar-prefetch per-batch valid lengths instead of shipping mask tensors:
    # removes two HBM operands and their narrow (lane-width 1 / 8) pipeline
    # buffers; the additive masks are rebuilt in-kernel with iota + compare.
    # TODO(synk): assumes Cmask/Qmask are contiguous padding masks (the QANet
    #             usage); arbitrary masks would need a lane-dense mask-array path.
    c_len = jnp.sum(Cmask.astype(jnp.int32), axis=-1).astype(jnp.int32)  # (B,)
    q_len = jnp.sum(Qmask.astype(jnp.int32), axis=-1).astype(jnp.int32)  # (B,)

    # Weights packed column-major (D, 3): w4C / w4Q / w4mlu slice out as (D, 1)
    # columns that broadcast directly against the (D, L) NCL tiles.
    w_packed = jnp.stack(
        [jnp.reshape(w4C, (D,)), jnp.reshape(w4Q, (D,)), jnp.reshape(w4mlu, (D,))],
        axis=1).astype(jnp.float32)                                      # (D, 3)
    bias_arr = jnp.asarray(bias, jnp.float32).reshape(1)                 # (1,) SMEM

    kernel = functools.partial(_cq_attention_kernel, D=D, mxu_dtype=mxu_dtype)

    return pl.pallas_call(
        kernel,
        out_shape=jax.ShapeDtypeStruct((B, 4 * D, Lc), jnp.float32),
        grid_spec=pltpu.PrefetchScalarGridSpec(
            num_scalar_prefetch=2,                       # c_len, q_len -> SMEM
            grid=(B,),
            in_specs=[
                pl.BlockSpec((1, D, Lc), lambda b, cl, ql: (b, 0, 0)),   # C (NCL)
                pl.BlockSpec((1, D, Lq), lambda b, cl, ql: (b, 0, 0)),   # Q (NCL)
                pl.BlockSpec((D, 3), lambda b, cl, ql: (0, 0)),          # weights
                pl.BlockSpec(memory_space=pltpu.MemorySpace.SMEM),       # bias
            ],
            out_specs=pl.BlockSpec((1, 4 * D, Lc), lambda b, cl, ql: (b, 0, 0)),
        ),
        compiler_params=pltpu.CompilerParams(
            dimension_semantics=("parallel",)),          # batch across v7x TCs
    )(c_len, q_len, C_ncl, Q_ncl, w_packed, bias_arr)


def _reference(C_ncl, Q_ncl, Cmask, Qmask, w4C, w4Q, w4mlu, bias):
    """Pure-JAX reference matching the PyTorch forward (dropout disabled).
    Uses HIGHEST matmul precision so the f32 kernel path can be checked tightly."""
    prec = lax.Precision.HIGHEST
    Bsz, D, Lc = C_ncl.shape
    Lq = Q_ncl.shape[2]
    C = jnp.transpose(C_ncl, (0, 2, 1))                                  # (B, Lc, D)
    Q = jnp.transpose(Q_ncl, (0, 2, 1))                                  # (B, Lq, D)
    w4C_ = jnp.reshape(w4C, (D, 1))
    w4Q_ = jnp.reshape(w4Q, (D, 1))
    w4mlu_ = jnp.reshape(w4mlu, (1, 1, D))

    subres0 = jnp.matmul(C, w4C_, precision=prec)                        # (B, Lc, 1)
    subres1 = jnp.transpose(jnp.matmul(Q, w4Q_, precision=prec), (0, 2, 1))
    subres2 = jnp.einsum("bid,bjd->bij", C * w4mlu_, Q, precision=prec)
    S = subres0 + subres1 + subres2 + jnp.reshape(bias, ())              # (B, Lc, Lq)

    qm = NEG_INF * (1.0 - Qmask.astype(jnp.float32)).reshape(Bsz, 1, Lq)
    cm = NEG_INF * (1.0 - Cmask.astype(jnp.float32)).reshape(Bsz, Lc, 1)
    S1 = jax.nn.softmax(S + qm, axis=2)
    S2 = jax.nn.softmax(S + cm, axis=1)

    A = jnp.matmul(S1, Q, precision=prec)                                # (B, Lc, D)
    Bm = jnp.matmul(jnp.matmul(S1, jnp.transpose(S2, (0, 2, 1)), precision=prec),
                    C, precision=prec)
    out = jnp.concatenate([C, A, C * A, C * Bm], axis=2)                 # (B, Lc, 4D)
    return jnp.transpose(out, (0, 2, 1))                                 # (B, 4D, Lc)


if __name__ == "__main__":
    # Small shapes consistent with the module: hidden=32, Lc=16, Lq=8, batch=2.
    B, D, Lc, Lq = 2, 32, 16, 8

    key = jax.random.PRNGKey(0)
    kc, kq, k1, k2, k3 = jax.random.split(key, 5)

    # xavier-uniform-style deterministic init, parameter shapes as in the module
    lim = math.sqrt(6.0 / (D + 1))
    w4C = jax.random.uniform(k1, (D, 1), jnp.float32, -lim, lim)
    w4Q = jax.random.uniform(k2, (D, 1), jnp.float32, -lim, lim)
    w4mlu = jax.random.uniform(k3, (1, 1, D), jnp.float32, -lim, lim)
    bias = jnp.zeros((1,), jnp.float32)                  # nn.init.constant_(bias, 0)

    C = jax.random.normal(kc, (B, D, Lc), jnp.float32)   # NCL, like the torch call
    Q = jax.random.normal(kq, (B, D, Lq), jnp.float32)
    c_len = jnp.array([12, 16], dtype=jnp.int32)
    q_len = jnp.array([5, 8], dtype=jnp.int32)
    Cmask = (jnp.arange(Lc)[None, :] < c_len[:, None]).astype(jnp.float32)
    Qmask = (jnp.arange(Lq)[None, :] < q_len[:, None]).astype(jnp.float32)

    out_f32 = cq_attention_pallas(C, Q, Cmask, Qmask, w4C, w4Q, w4mlu, bias,
                                  mxu_dtype=jnp.float32)
    out_bf16 = cq_attention_pallas(C, Q, Cmask, Qmask, w4C, w4Q, w4mlu, bias)
    jax.block_until_ready((out_f32, out_bf16))

    ref = _reference(C, Q, Cmask, Qmask, w4C, w4Q, w4mlu, bias)

    assert out_f32.shape == (B, 4 * D, Lc)
    assert out_bf16.shape == (B, 4 * D, Lc)
    # f32-MXU path: tight match (approx reciprocal is Newton-refined, so the
    # previous 1e-2 tolerance is no longer needed).
    assert jnp.allclose(out_f32, ref, atol=2e-3, rtol=2e-3), "f32 path mismatch"
    # bf16-MXU path (production default): bf16 operand rounding propagates
    # through the chained attention matmuls; bound it rather than pretend it's
    # exact.  Softmax math itself stays f32.
    bf16_err = jnp.abs(out_bf16 - ref)
    assert float(jnp.mean(bf16_err)) < 2e-2, "bf16 path mean error too large"
    assert float(jnp.max(bf16_err)) < 3.5e-1, "bf16 path max error too large"

    print("KERNEL_OK")
</pallas_src>

<mosaic_0001>
module attributes {stable_mosaic.version = 11 : i64} {
  func.func @_cq_attention_kernel(%arg0: i32, %arg1: memref<2xi32, #tpu.memory_space<smem>>, %arg2: memref<2xi32, #tpu.memory_space<smem>>, %arg3: memref<1x32x16xf32, #tpu.memory_space<vmem>>, %arg4: memref<1x32x8xf32, #tpu.memory_space<vmem>>, %arg5: memref<32x3xf32, #tpu.memory_space<vmem>>, %arg6: memref<1xf32, #tpu.memory_space<smem>>, %arg7: memref<1x128x16xf32, #tpu.memory_space<vmem>>) attributes {dimension_semantics = [#tpu.dimension_semantics<parallel>], iteration_bounds = array<i64: 2>, scalar_prefetch = 2 : i64, scratch_operands = 0 : i64, tpu.core_type = #tpu.core_type<tc>, window_params = [{transform_indices = @transform_0, window_bounds = array<i64: 1, 32, 16>}, {transform_indices = @transform_1, window_bounds = array<i64: 1, 32, 8>}, {pipeline_mode = #tpu.pipeline_mode<synchronous>, transform_indices = @transform_2, window_bounds = array<i64: 32, 3>}, {transform_indices = @transform_3, window_bounds = array<i64: 1>}, {transform_indices = @transform_4, window_bounds = array<i64: 1, 128, 16>}]} {
    %c0 = arith.constant 0 : index
    %c0_0 = arith.constant 0 : index
    %c0_1 = arith.constant 0 : index
    %0 = vector.load %arg3[%c0, %c0_0, %c0_1] : memref<1x32x16xf32, #tpu.memory_space<vmem>>, vector<1x32x16xf32>
    %1 = vector.shape_cast %0 : vector<1x32x16xf32> to vector<32x16xf32>
    %c0_2 = arith.constant 0 : index
    %c0_3 = arith.constant 0 : index
    %c0_4 = arith.constant 0 : index
    %2 = vector.load %arg4[%c0_2, %c0_3, %c0_4] : memref<1x32x8xf32, #tpu.memory_space<vmem>>, vector<1x32x8xf32>
    %3 = vector.shape_cast %2 : vector<1x32x8xf32> to vector<32x8xf32>
    %c0_5 = arith.constant 0 : index
    %4 = memref.load %arg6[%c0_5] : memref<1xf32, #tpu.memory_space<smem>>
    %c0_6 = arith.constant 0 : index
    %c0_7 = arith.constant 0 : index
    %5 = vector.load %arg5[%c0_6, %c0_7] : memref<32x3xf32, #tpu.memory_space<vmem>>, vector<32x1xf32>
    %c0_8 = arith.constant 0 : index
    %c1 = arith.constant 1 : index
    %6 = vector.load %arg5[%c0_8, %c1] : memref<32x3xf32, #tpu.memory_space<vmem>>, vector<32x1xf32>
    %c0_9 = arith.constant 0 : index
    %c2 = arith.constant 2 : index
    %7 = vector.load %arg5[%c0_9, %c2] : memref<32x3xf32, #tpu.memory_space<vmem>>, vector<32x1xf32>
    %8 = arith.index_cast %arg0 : i32 to index
    %9 = memref.load %arg1[%8] : memref<2xi32, #tpu.memory_space<smem>>
    %10 = arith.index_cast %arg0 : i32 to index
    %11 = memref.load %arg2[%10] : memref<2xi32, #tpu.memory_space<smem>>
    %12 = tpu.iota {dimensions = array<i32: 1>} : vector<1x16xi32>
    %13 = tpu.iota {dimensions = array<i32: 0>} : vector<8x1xi32>
    %14 = vector.broadcast %9 : i32 to vector<1x16xi32>
    %15 = arith.cmpi slt, %12, %14 : vector<1x16xi32>
    %cst = arith.constant 0.000000e+00 : f32
    %cst_10 = arith.constant -1.000000e+30 : f32
    %16 = vector.broadcast %cst : f32 to vector<1x16xf32>
    %17 = vector.broadcast %cst_10 : f32 to vector<1x16xf32>
    %18 = arith.select %15, %16, %17 : vector<1x16xi1>, vector<1x16xf32>
    %19 = vector.broadcast %11 : i32 to vector<8x1xi32>
    %20 = arith.cmpi slt, %13, %19 : vector<8x1xi32>
    %cst_11 = arith.constant 0.000000e+00 : f32
    %cst_12 = arith.constant -1.000000e+30 : f32
    %21 = vector.broadcast %cst_11 : f32 to vector<8x1xf32>
    %22 = vector.broadcast %cst_12 : f32 to vector<8x1xf32>
    %23 = arith.select %20, %21, %22 : vector<8x1xi1>, vector<8x1xf32>
    %24 = vector.broadcast %7 : vector<32x1xf32> to vector<32x8xf32>
    %25 = arith.mulf %3, %24 : vector<32x8xf32>
    %26 = vector.broadcast %5 : vector<32x1xf32> to vector<32x8xf32>
    %27 = arith.addf %25, %26 : vector<32x8xf32>
    %cst_13 = arith.constant dense<0.000000e+00> : vector<8x16xf32>
    %28 = tpu.matmul %27, %1, %cst_13 {dimension_numbers = #tpu.dot_dimension_numbers<[0], [0], [1], [1], [0, 1, 1, 1], [], []>, precision = #tpu.contract_precision<fp32>} : vector<32x8xf32>, vector<32x16xf32>, vector<8x16xf32> -> vector<8x16xf32>
    %cst_14 = arith.constant dense<0.000000e+00> : vector<8x1xf32>
    %29 = tpu.matmul %3, %6, %cst_14 {dimension_numbers = #tpu.dot_dimension_numbers<[0], [0], [1], [1], [0, 1, 1, 1], [], []>, precision = #tpu.contract_precision<fp32>} : vector<32x8xf32>, vector<32x1xf32>, vector<8x1xf32> -> vector<8x1xf32>
    %30 = vector.broadcast %4 : f32 to vector<8x1xf32>
    %31 = arith.addf %29, %30 : vector<8x1xf32>
    %32 = arith.addf %31, %23 : vector<8x1xf32>
    %33 = vector.broadcast %32 : vector<8x1xf32> to vector<8x16xf32>
    %34 = arith.addf %28, %33 : vector<8x16xf32>
    %cst_15 = arith.constant dense<0xFF800000> : vector<16xf32>
    %35 = vector.multi_reduction <maximumf>, %34, %cst_15 [0] : vector<8x16xf32> to vector<16xf32>
    %36 = vector.shape_cast %35 : vector<16xf32> to vector<1x16xf32>
    %37 = vector.broadcast %36 : vector<1x16xf32> to vector<8x16xf32>
    %38 = arith.subf %34, %37 : vector<8x16xf32>
    %39 = math.exp %38 : vector<8x16xf32>
    %cst_16 = arith.constant dense<0.000000e+00> : vector<16xf32>
    %40 = vector.multi_reduction <add>, %39, %cst_16 [0] : vector<8x16xf32> to vector<16xf32>
    %41 = vector.shape_cast %40 : vector<16xf32> to vector<1x16xf32>
    %42 = tpu.reciprocal %41 {approx = true} : vector<1x16xf32> -> vector<1x16xf32>
    %43 = arith.mulf %41, %42 : vector<1x16xf32>
    %cst_17 = arith.constant 2.000000e+00 : f32
    %44 = vector.broadcast %cst_17 : f32 to vector<1x16xf32>
    %45 = arith.subf %44, %43 : vector<1x16xf32>
    %46 = arith.mulf %42, %45 : vector<1x16xf32>
    %47 = vector.broadcast %46 : vector<1x16xf32> to vector<8x16xf32>
    %48 = arith.mulf %39, %47 : vector<8x16xf32>
    %49 = vector.broadcast %18 : vector<1x16xf32> to vector<8x16xf32>
    %50 = arith.addf %28, %49 : vector<8x16xf32>
    %cst_18 = arith.constant dense<0xFF800000> : vector<8xf32>
    %51 = vector.multi_reduction <maximumf>, %50, %cst_18 [1] : vector<8x16xf32> to vector<8xf32>
    %52 = vector.shape_cast %51 : vector<8xf32> to vector<8x1xf32>
    %53 = vector.broadcast %52 : vector<8x1xf32> to vector<8x16xf32>
    %54 = arith.subf %50, %53 : vector<8x16xf32>
    %55 = math.exp %54 : vector<8x16xf32>
    %cst_19 = arith.constant dense<0.000000e+00> : vector<8xf32>
    %56 = vector.multi_reduction <add>, %55, %cst_19 [1] : vector<8x16xf32> to vector<8xf32>
    %57 = vector.shape_cast %56 : vector<8xf32> to vector<8x1xf32>
    %58 = tpu.reciprocal %57 {approx = true} : vector<8x1xf32> -> vector<8x1xf32>
    %59 = arith.mulf %57, %58 : vector<8x1xf32>
    %cst_20 = arith.constant 2.000000e+00 : f32
    %60 = vector.broadcast %cst_20 : f32 to vector<8x1xf32>
    %61 = arith.subf %60, %59 : vector<8x1xf32>
    %62 = arith.mulf %58, %61 : vector<8x1xf32>
    %63 = vector.broadcast %62 : vector<8x1xf32> to vector<8x16xf32>
    %64 = arith.mulf %55, %63 : vector<8x16xf32>
    %cst_21 = arith.constant dense<0.000000e+00> : vector<32x16xf32>
    %65 = tpu.matmul %3, %48, %cst_21 {dimension_numbers = #tpu.dot_dimension_numbers<[1], [0], [0], [1], [0, 0, 1, 1], [], []>, precision = #tpu.contract_precision<fp32>} : vector<32x8xf32>, vector<8x16xf32>, vector<32x16xf32> -> vector<32x16xf32>
    %cst_22 = arith.constant dense<0.000000e+00> : vector<16x16xf32>
    %66 = tpu.matmul %48, %64, %cst_22 {dimension_numbers = #tpu.dot_dimension_numbers<[0], [0], [1], [1], [0, 1, 1, 1], [], []>, precision = #tpu.contract_precision<fp32>} : vector<8x16xf32>, vector<8x16xf32>, vector<16x16xf32> -> vector<16x16xf32>
    %cst_23 = arith.constant dense<0.000000e+00> : vector<32x16xf32>
    %67 = tpu.matmul %1, %66, %cst_23 {dimension_numbers = #tpu.dot_dimension_numbers<[1], [1], [0], [0], [0, 0, 1, 0], [], []>, precision = #tpu.contract_precision<fp32>} : vector<32x16xf32>, vector<16x16xf32>, vector<32x16xf32> -> vector<32x16xf32>
    %c0_24 = arith.constant 0 : index
    %c0_25 = arith.constant 0 : index
    %c0_26 = arith.constant 0 : index
    %68 = vector.load %arg7[%c0_24, %c0_25, %c0_26] : memref<1x128x16xf32, #tpu.memory_space<vmem>>, vector<1x32x16xf32>
    %69 = vector.shape_cast %68 : vector<1x32x16xf32> to vector<32x16xf32>
    %70 = vector.shape_cast %1 : vector<32x16xf32> to vector<1x32x16xf32>
    tpu.vector_store %arg7[%c0_24, %c0_25, %c0_26], %70 {strides = array<i32>} : memref<1x128x16xf32, #tpu.memory_space<vmem>>, vector<1x32x16xf32>,
    %c0_27 = arith.constant 0 : index
    %c32 = arith.constant 32 : index
    %c0_28 = arith.constant 0 : index
    %71 = vector.load %arg7[%c0_27, %c32, %c0_28] : memref<1x128x16xf32, #tpu.memory_space<vmem>>, vector<1x32x16xf32>
    %72 = vector.shape_cast %71 : vector<1x32x16xf32> to vector<32x16xf32>
    %73 = vector.shape_cast %65 : vector<32x16xf32> to vector<1x32x16xf32>
    tpu.vector_store %arg7[%c0_27, %c32, %c0_28], %73 {strides = array<i32>} : memref<1x128x16xf32, #tpu.memory_space<vmem>>, vector<1x32x16xf32>,
    %74 = arith.mulf %1, %65 : vector<32x16xf32>
    %c0_29 = arith.constant 0 : index
    %c64 = arith.constant 64 : index
    %c0_30 = arith.constant 0 : index
    %75 = vector.load %arg7[%c0_29, %c64, %c0_30] : memref<1x128x16xf32, #tpu.memory_space<vmem>>, vector<1x32x16xf32>
    %76 = vector.shape_cast %75 : vector<1x32x16xf32> to vector<32x16xf32>
    %77 = vector.shape_cast %74 : vector<32x16xf32> to vector<1x32x16xf32>
    tpu.vector_store %arg7[%c0_29, %c64, %c0_30], %77 {strides = array<i32>} : memref<1x128x16xf32, #tpu.memory_space<vmem>>, vector<1x32x16xf32>,
    %78 = arith.mulf %1, %67 : vector<32x16xf32>
    %c0_31 = arith.constant 0 : index
    %c96 = arith.constant 96 : index
    %c0_32 = arith.constant 0 : index
    %79 = vector.load %arg7[%c0_31, %c96, %c0_32] : memref<1x128x16xf32, #tpu.memory_space<vmem>>, vector<1x32x16xf32>
    %80 = vector.shape_cast %79 : vector<1x32x16xf32> to vector<32x16xf32>
    %81 = vector.shape_cast %78 : vector<32x16xf32> to vector<1x32x16xf32>
    tpu.vector_store %arg7[%c0_31, %c96, %c0_32], %81 {strides = array<i32>} : memref<1x128x16xf32, #tpu.memory_space<vmem>>, vector<1x32x16xf32>,
    return
  }
  func.func @transform_0(%arg0: i32, %arg1: memref<2xi32, #tpu.memory_space<smem>>, %arg2: memref<2xi32, #tpu.memory_space<smem>>) -> (i32, i32, i32) {
    %c0_i32 = arith.constant 0 : i32
    %c0_i32_0 = arith.constant 0 : i32
    %c0_i32_1 = arith.constant 0 : i32
    return %arg0, %c0_i32, %c0_i32_0 : i32, i32, i32
  }
  func.func @transform_1(%arg0: i32, %arg1: memref<2xi32, #tpu.memory_space<smem>>, %arg2: memref<2xi32, #tpu.memory_space<smem>>) -> (i32, i32, i32) {
    %c0_i32 = arith.constant 0 : i32
    %c0_i32_0 = arith.constant 0 : i32
    %c0_i32_1 = arith.constant 0 : i32
    return %arg0, %c0_i32, %c0_i32_0 : i32, i32, i32
  }
  func.func @transform_2(%arg0: i32, %arg1: memref<2xi32, #tpu.memory_space<smem>>, %arg2: memref<2xi32, #tpu.memory_space<smem>>) -> (i32, i32) {
    %c0_i32 = arith.constant 0 : i32
    %c0_i32_0 = arith.constant 0 : i32
    %c0_i32_1 = arith.constant 0 : i32
    return %c0_i32, %c0_i32_0 : i32, i32
  }
  func.func @transform_3(%arg0: i32, %arg1: memref<2xi32, #tpu.memory_space<smem>>, %arg2: memref<2xi32, #tpu.memory_space<smem>>) -> i32 {
    %c0_i32 = arith.constant 0 : i32
    %c0_i32_0 = arith.constant 0 : i32
    return %c0_i32 : i32
  }
  func.func @transform_4(%arg0: i32, %arg1: memref<2xi32, #tpu.memory_space<smem>>, %arg2: memref<2xi32, #tpu.memory_space<smem>>) -> (i32, i32, i32) {
    %c0_i32 = arith.constant 0 : i32
    %c0_i32_0 = arith.constant 0 : i32
    %c0_i32_1 = arith.constant 0 : i32
    return %arg0, %c0_i32, %c0_i32_0 : i32, i32, i32
  }
}

</mosaic_0001>

<bundles_post_ra>
// kernel: tpu_custom_call.1
= control target key start
LH: loop header
LB: loop body
LE: loop exit
PB: predicated region body
PF: predicated region fallthrough
CT: control target
= control target key end

     0   :  { %s4171_s0 = inlined_call_operand.vmem [shape: s32[2], index: 0, kind: input, shape index: {}]   ;;  %s4172_s2 = inlined_call_operand.vmem [shape: f32[2,32,16], index: 2, kind: input, shape index: {}]   ;;  %s4173_s3 = inlined_call_operand.vmem [shape: f32[2,32,8], index: 3, kind: input, shape index: {}]   ;;  %s4174_s4 = inlined_call_operand.vmem [shape: f32[32,3], index: 4, kind: input, shape index: {}]   ;;  %s4175_s6 = inlined_call_operand.vmem [shape: f32[2,128,16], index: 6, kind: output, shape index: {}]   ;;  %s4176_s1 = inlined_call_operand.vmem [shape: s32[2], index: 1, kind: input, shape index: {}]   ;;  %s4177_s5 = inlined_call_operand.<no memory space> [shape: f32[1], index: 5, kind: input, shape index: {}]  }
   0x1   :  { %s11_s23 = sshll.u32 %s4171_s0, 4  ;;  %s15_s26 = sshll.u32 %s4176_s1, 4  ;;  %s12_s23 = int_to_ptr.vmem [resolvable:$true] %s11_s23  ;;  %s16_s26 = int_to_ptr.vmem [resolvable:$true] %s15_s26 }
   0x2   :  { %s3670_s27 = scalar_lea.vmem %s12_s23, 16  ;;  %p3675_p1 = scmp.lt.s32.totalorder %s12_s23, %s12_s23 }
   0x3   :  { %p3671_p0 = scmp.ne.s32.totalorder %s12_s23, %s3670_s27  ;;  %p3676_p2 = scmp.lt.s32.totalorder %s3670_s27, %s3670_s27 }
   0x5   :  { %p3677_p3 = por %p3676_p2, %p3675_p1 }
   0x7   :  { %p3678_p4 = pnand %p3677_p3, %p3671_p0 }
   0x9   :  { %3681 = shalt.err (!%p3678_p4)  }
   0xa   :  { %s3704_s28 = smov [#allocation3]   ;;  %s3682_s29 = scalar_lea.vmem %s16_s26, 16 }
   0xb   :  { %14 = dma.vmem_to_smem %s12_s23, 16, %s3704_s28, [#allocation2] }
   0xc   :  { %p3683_p5 = scmp.ne.s32.totalorder %s16_s26, %s3682_s29  ;;  %p3687_p6 = scmp.lt.s32.totalorder %s16_s26, %s16_s26 }
   0xd   :  { %p3688_p7 = scmp.lt.s32.totalorder %s3682_s29, %s3682_s29 }
   0xf   :  { %p3689_p8 = por %p3688_p7, %p3687_p6 }
  0x11   :  { %p3690_p9 = pnand %p3689_p8, %p3683_p5 }
  0x13   :  { %3693 = shalt.err (!%p3690_p9)  }
  0x14   :  { %s3705_s0 = smov [#allocation4]   ;;  %19 = sst [smem:[#allocation5]] %s4177_s5 }
  0x15   :  { %18 = dma.vmem_to_smem %s16_s26, 16, %s3705_s0, [#allocation2] }
  0x16   :  { %3698 = dma.done.wait [#allocation2], 32 }
  0x17   :  { %3699 = vsyncadd [#allocation2], 4294967264 }
  0x18   :  { %21 = sfence }
  0x19   :  { %s3756_s7 = smov 0  }
  0x1a LB: > { %s3762_s8 = sadd.s32 4294967295, %s3702_s7   ;;  %p3215_p10 = scmp.ge.s32.totalorder %s3702_s7, 1  ;;  %s3702_s7 = sphi %s3756_s7, %s27_s7  }
  0x1b   : > { %p185_p11 = scmp.lt.s32.totalorder %s3702_s7, 3 }
  0x1d   : > { %p186_p12 = pnand %p3215_p10, %p185_p11 }
  0x1e   : > { %p216_p13 = scmp.lt.s32.totalorder (!%p186_p12), %s3762_s8, 1  ;;  %s3708_s25 = smov (!%p186_p12), 127  }
  0x1f   : > { %189 = sbr.rel (%p186_p12) target bundleno = 1329 (0x531), region = 36  ;;  %s244_s29 = sld [smem:[#allocation3 + %s3762_s8]] (!%p186_p12) }
  0x20   : > { %s239_s0 = sld [smem:[#allocation5]] (!%p186_p12) }
  0x21   : > { %s245_s1 = sld [smem:[#allocation4 + %s3762_s8]] (!%p186_p12) }
  0x24   : > { %v240_v0 = vld [vmem:[%s4174_s4] sm:$0xff]  ;;  %v3706_v1 = vmov 0   ;;  %v3707_v2 = vmov 2   ;;  %v241_v3 = vld [vmem:[%s4174_s4 + $0x8] sm:$0xff]  ;;  %s3774_s12 = scalar_select %p216_p13, %s3762_s8, 1  ;;  %v242_v4 = vld [vmem:[%s4174_s4 + $0x10] sm:$0xff] }
  0x25   : > { %3658 = vset.pattern.permute.xlu1 %v3706_v1  ;;  %3657 = vset.pattern.permute.xlu0 %v3707_v2  ;;  %vm1361_vm0 = vcmask 130048   ;;  %v243_v8 = vld [vmem:[%s4174_s4 + $0x18] sm:$0xff]  ;;  %v3709_v12 = vmov 0.0   ;;  %vm3710_vm1 = vmmov 0   ;;  %vm332_vm2 = vcmask 261120  }
  0x26   : > { %281 = vperm.xlu1 %3658, %v240_v0   ;;  %258 = vperm.xlu0 %3657, %v240_v0   ;;  %s3224_s15 = sshll.u32 %s3774_s12, 5  ;;  %s3226_s16 = sshll.u32 %s3774_s12, 7  ;;  %vm1399_vm3 = vcmask 64512  }
  0x27   : > { %s220_s19 = scalar_lea.vmem %s4172_s2, %s3224_s15  ;;  %s3789_s22 = scalar_lea.vmem %s4175_s6, %s3226_s16  ;;  %3382 = vmatprep.subr.mxu1 %v3709_v12  ;;  %3371 = vmatprep.subr.mxu0 %v3709_v12 }
  0x28   : > { %v3791_v5 = vld [vmem:[%s220_s19] sm:$0xff]  ;;  %v3793_v6 = vld [vmem:[%s220_s19 + $0x8] sm:$0xff]  ;;  %v3795_v7 = vld [vmem:[%s220_s19 + $0x10] sm:$0xff]  ;;  %s225_s28 = scalar_lea.vmem %s4173_s3, %s3224_s15  ;;  %3390 = vmatprep.mubr.msk.f32.mxu1 %vm3710_vm1, %v3709_v12  ;;  %3379 = vmatprep.mubr.msk.f32.mxu0 %vm3710_vm1, %v3709_v12 }
  0x29   : > { %v3800_v9 = vld [vmem:[%s220_s19 + $0x18] sm:$0xff]  ;;  %3120 = vst.msk [vmem:[%s3789_s22] sm:$0xff] %vm1361_vm0, %v3791_v5  ;;  %3121 = vst.msk [vmem:[%s3789_s22 + $0x8] sm:$0xff] %vm1361_vm0, %v3793_v6  ;;  %v3818_v11 = vand.u32 4294901760, %v3795_v7  ;;  %v3849_v21 = vld [vmem:[%s225_s28] sm:$0xff]  ;;  %v3862_v25 = vand.u32 4294901760, %v3793_v6 }
  0x2a   : > { %3659 = vset.pattern.permute.xlu1 %v3707_v2  ;;  %263 = vperm.xlu0 %3657, %v241_v3   ;;  %3122 = vst.msk [vmem:[%s3789_s22 + $0x10] sm:$0xff] %vm1361_vm0, %v3795_v7  ;;  %3123 = vst.msk [vmem:[%s3789_s22 + $0x18] sm:$0xff] %vm1361_vm0, %v3800_v9  ;;  %v3815_v10 = vand.u32 4294901760, %v3800_v9  ;;  %v3852_v22 = vld [vmem:[%s225_s28 + $0x8] sm:$0xff]  ;;  %v3855_v23 = vld [vmem:[%s225_s28 + $0x10] sm:$0xff]  ;;  %v3869_v27 = vand.u32 4294901760, %v3791_v5 }
  0x2b   : > { %268 = vperm.xlu1 %3659, %v242_v4   ;;  %v3828_v14 = vsub.f32 %v3795_v7, %v3818_v11  ;;  %v3858_v24 = vld [vmem:[%s225_s28 + $0x18] sm:$0xff]  ;;  %v3866_v26 = vsub.f32 %v3793_v6, %v3862_v25 }
  0x2c   : > { %v3824_v13 = vsub.f32 %v3800_v9, %v3815_v10  ;;  %3372 = vmatpush3.msra.mxu0 %v3815_v10  ;;  %v3876_v29 = vsub.f32 %v3791_v5, %v3869_v27 }
  0x2d   : > { %3373 = vmatprep.subr.mxu0 %v3709_v12  ;;  %v449_v16 = vand.u32 4294901760, %v3828_v14  ;;  %v456_v28 = vand.u32 4294901760, %v3866_v26 }
  0x2e   : > { %3660 = vset.pattern.permute.xlu0 %v3706_v1  ;;  %v442_v15 = vand.u32 4294901760, %v3824_v13  ;;  %3374 = vmatpush3.msra.mxu0 %v3818_v11  ;;  %v463_v34 = vand.u32 4294901760, %v3876_v29 }
  0x2f   : > { %273 = vperm.xlu1 %3659, %v243_v8   ;;  %285 = vperm.xlu0 %3660, %v241_v3   ;;  %v450_v18 = vsub.f32 %v3828_v14, %v449_v16  ;;  %v457_v33 = vsub.f32 %v3866_v26, %v456_v28 }
  0x30   : > { %3375 = vmatprep.subr.mxu0 %v3709_v12  ;;  %v443_v17 = vsub.f32 %v3824_v13, %v442_v15  ;;  %v464_v37 = vsub.f32 %v3876_v29, %v463_v34 }
  0x31   : > { %v451_v20 = vand.u32 4294901760, %v450_v18  ;;  %3376 = vmatpush3.msra.mxu0 %v3862_v25  ;;  %v458_v36 = vand.u32 4294901760, %v457_v33 }
  0x32   : > { %v444_v19 = vand.u32 4294901760, %v443_v17  ;;  %3377 = vmatprep.subr.mxu0 %v3709_v12  ;;  %v465_v40 = vand.u32 4294901760, %v464_v37 }
  0x33   : > { %3661 = vset.pattern.permute.xlu1 %v3706_v1  ;;  %293 = vperm.xlu0 %3660, %v243_v8  }
  0x34   : > { %289 = vperm.xlu1 %3661, %v242_v4   ;;  %3383 = vmatpush3.msra.mxu1 %v444_v19 }
  0x35   : > { %3384 = vmatprep.subr.mxu1 %v3709_v12  ;;  %3378 = vmatpush3.msra.mxu0 %v3869_v27 }
  0x36   : > { %3385 = vmatpush3.msra.mxu1 %v451_v20  ;;  %3393 = vmatprep.subr.mxu0 %v3709_v12 }
  0x37   : > { %858 = vrot.lane.b32.xlu0 %v242_v4, %s3708_s25  ;;  %3386 = vmatprep.subr.mxu1 %v3709_v12 }
  0x38   : > { %860 = vrot.lane.b32.xlu1 %v243_v8, %s3708_s25  ;;  %3387 = vmatpush3.msra.mxu1 %v458_v36 }
  0x39   : > { %3388 = vmatprep.subr.mxu1 %v3709_v12 }
  0x3a   : > { %3389 = vmatpush3.msra.mxu1 %v465_v40 }
  0x3b   : > { %3404 = vmatprep.subr.mxu1 %v3709_v12 }
  0x3c   : > { %856 = vrot.lane.b32.xlu1 %v241_v3, %s3708_s25 }
  0x40   : > { %854 = vrot.lane.b32.xlu1 %v240_v0, %s3708_s25 }
  0x69   : > { %822 = vxpose.xlu1.b32.start [1/4] (short) (narrow) %v3849_v21, 8 }
  0x6d   : > { %823 = vxpose.xlu1.b32.cont [2/4] (short) (narrow) %v3852_v22, 8 }
  0x71   : > { %824 = vxpose.xlu1.b32.cont [3/4] (short) (narrow) %v3855_v23, 8 }
  0x75   : > { %825 = vxpose.xlu1.b32.end [4/4] (short) (narrow) %v3858_v24, 8 }
  0xa1   : > { %v282_v30 = vpop.permute.xlu1 %281  ;;  %v259_v31 = vpop.permute.xlu0 %258 }
  0xa2   : > { %v276_v32 = vmul.f32 %v259_v31, %v3849_v21 }
  0xa4   : > { %v296_v35 = vadd.f32 %v282_v30, %v276_v32 }
  0xa5   : > { %v264_v38 = vpop.permute.xlu0 %263 }
  0xa6   : > { %v269_v39 = vpop.permute.xlu1 %268  ;;  %300 = vxpose.xlu0.b32.start [1/4] (short) (narrow) %v296_v35, 8  ;;  %v277_v41 = vmul.f32 %v264_v38, %v3852_v22 }
  0xa7   : > { %v278_v45 = vmul.f32 %v269_v39, %v3855_v23 }
  0xaa   : > { %v274_v42 = vpop.permute.xlu1 %273  ;;  %v286_v43 = vpop.permute.xlu0 %285 }
  0xab   : > { %v297_v44 = vadd.f32 %v286_v43, %v277_v41  ;;  %v279_v49 = vmul.f32 %v274_v42, %v3858_v24  ;;  %v246_v43 = vlaneseq }
  0xad   : > { %301 = vxpose.xlu0.b32.cont [2/4] (short) (narrow) %v297_v44, 8 }
  0xae   : > { %v294_v48 = vpop.permute.xlu0 %293 }
  0xaf   : > { %v290_v46 = vpop.permute.xlu1 %289  ;;  %v299_v50 = vadd.f32 %v294_v48, %v279_v49  ;;  %v250_v48 = vstv %s244_s29 }
  0xb0   : > { %v298_v47 = vadd.f32 %v290_v46, %v278_v45 }
  0xb2   : > { %302 = vxpose.xlu0.b32.cont [3/4] (short) (narrow) %v298_v47, 8  ;;  %v859_v51 = vpop.permute.xlu0 %858 }
  0xb3   : > { %v861_v52 = vpop.permute.xlu1 %860  ;;  %v3909_v60 = vand.u32 4294901760, %v859_v51 }
  0xb4   : > { %v3905_v58 = vand.u32 4294901760, %v861_v52 }
  0xb5   : > { %v3921_v2 = vsub.f32 %v859_v51, %v3909_v60 }
  0xb6   : > { %303 = vxpose.xlu0.b32.end [4/4] (short) (narrow) %v299_v50, 8  ;;  %v3914_v63 = vsub.f32 %v861_v52, %v3905_v58 }
  0xb7   : > { %v857_v56 = vpop.permute.xlu1 %856  ;;  %v982_v17 = vand.u32 4294901760, %v3921_v2 }
  0xb8   : > { %v3916_v0 = vand.u32 4294901760, %v857_v56  ;;  %v975_v4 = vand.u32 4294901760, %v3914_v63 }
  0xb9   : > { %v983_v20 = vsub.f32 %v3921_v2, %v982_v17 }
  0xba   : > { %v3929_v8 = vsub.f32 %v857_v56, %v3916_v0  ;;  %v976_v19 = vsub.f32 %v3914_v63, %v975_v4 }
  0xbb   : > { %v855_v62 = vpop.permute.xlu1 %854 }
  0xbc   : > { %v3923_v3 = vand.u32 4294901760, %v855_v62  ;;  %v977_v31 = vand.u32 4294901760, %v976_v19  ;;  %v253_v19 = vstv %s245_s1 }
  0xbe   : > { %v3937_v18 = vsub.f32 %v855_v62, %v3923_v3 }
 0x126   : > { %v316_v53 = vpop.trf.xlu0 }
 0x127   : > { %v334_v54 = vsel %vm332_vm2, %v316_v53, 0 }
 0x128   : > { %v3898_v55 = vand.u32 4294901760, %v334_v54 }
 0x12a   : > { %v406_v57 = vsub.f32 %v334_v54, %v3898_v55  ;;  %3391 = vmatmul.mubr.f32.vlgmr.msra.gmra.mxu1 %v3898_v55  ;;  %v3711_v54 = vmov -1e+30  }
 0x12b   : > { %3405 = vmatpush3.msra.mxu1 %v3815_v10  ;;  %3412 = vmatprep.mubr.msk.f32.mxu1 %vm3710_vm1, %v3709_v12 }
 0x12c   : > { %v407_v59 = vand.u32 4294901760, %v406_v57  ;;  %3406 = vmatprep.subr.mxu1 %v3709_v12 }
 0x12d   : > { %3407 = vmatpush3.msra.mxu1 %v3818_v11 }
 0x12e   : > { %3408 = vmatprep.subr.mxu1 %v3709_v12  ;;  %v408_v61 = vsub.f32 %v406_v57, %v407_v59 }
 0x12f   : > { %3409 = vmatpush3.msra.mxu1 %v3862_v25 }
 0x130   : > { %3410 = vmatprep.subr.mxu1 %v3709_v12  ;;  %v409_v1 = vand.u32 4294901760, %v408_v61 }
 0x131   : > { %3411 = vmatpush3.msra.mxu1 %v3869_v27 }
 0x132   : > { %3413 = vmatmul.mubr.f32.vlgmr.msra.gmra.mxu1 %v407_v59  ;;  %3426 = vmatprep.subr.mxu1 %v3709_v12 }
 0x133   : > { %3380 = vmatmul.mubr.f32.vlgmr.msra.gmra.mxu0 %v409_v1  ;;  %3427 = vmatpush3.msra.mxu1 %v3815_v10  ;;  %v838_v10 = vpop.trf.xlu1 }
 0x134   : > { %3394 = vmatpush3.msra.mxu0 %v3824_v13  ;;  %3428 = vmatprep.subr.mxu1 %v3709_v12  ;;  %v867_v30 = vsel %vm332_vm2, %v838_v10, 0  ;;  %v249_v10 = vshrl.u32 %v246_v43, 7 }
 0x135   : > { %3395 = vmatprep.subr.mxu0 %v3709_v12  ;;  %3429 = vmatpush3.msra.mxu1 %v3818_v11  ;;  %v989_v11 = vand.u32 4294901760, %v3929_v8  ;;  %v3967_v33 = vand.u32 4294901760, %v867_v30 }
 0x136   : > { %3396 = vmatpush3.msra.mxu0 %v3828_v14  ;;  %3430 = vmatprep.subr.mxu1 %v3709_v12  ;;  %vm254_vm5 = vcmp.lt.s32.totalorder %v249_v10, %v253_v19 }
 0x137   : > { %3397 = vmatprep.subr.mxu0 %v3709_v12  ;;  %3431 = vmatpush3.msra.mxu1 %v3862_v25  ;;  %v996_v25 = vand.u32 4294901760, %v3937_v18  ;;  %v990_v32 = vsub.f32 %v3929_v8, %v989_v11  ;;  %v939_v13 = vsub.f32 %v867_v30, %v3967_v33 }
 0x138   : > { %3398 = vmatpush3.msra.mxu0 %v3866_v26  ;;  %3432 = vmatprep.subr.mxu1 %v3709_v12 }
 0x139   : > { %3399 = vmatprep.subr.mxu0 %v3709_v12  ;;  %3401 = vmatprep.mubr.msk.f32.mxu0 %vm3710_vm1, %v3709_v12  ;;  %v997_v35 = vsub.f32 %v3937_v18, %v996_v25  ;;  %v991_v36 = vand.u32 4294901760, %v990_v32  ;;  %v940_v14 = vand.u32 4294901760, %v939_v13 }
 0x13a   : > { %3400 = vmatpush3.msra.mxu0 %v3876_v29  ;;  %3433 = vmatpush3.msra.mxu1 %v3869_v27  ;;  %v984_v27 = vand.u32 4294901760, %v983_v20 }
 0x13b   : > { %3434 = vmatprep.mubr.msk.f32.mxu1 %vm3710_vm1, %v3709_v12  ;;  %3402 = vmatmul.mubr.f32.vlgmr.msra.gmra.mxu0 %v406_v57 }
 0x13c   : > { %3415 = vmatprep.subr.mxu0 %v3709_v12  ;;  %3435 = vmatmul.mubr.f32.vlgmr.msra.gmra.mxu1 %v3898_v55 }
 0x13d   : > { %3448 = vmatprep.subr.mxu1 %v3709_v12  ;;  %3416 = vmatpush3.msra.mxu0 %v442_v15  ;;  %v998_v15 = vand.u32 4294901760, %v997_v35 }
 0x13e   : > { %3449 = vmatpush3.msra.mxu1 %v977_v31  ;;  %3417 = vmatprep.subr.mxu0 %v3709_v12  ;;  %v255_v31 = vsel %vm254_vm5, 0.0, %v3711_v54 }
 0x13f   : > { %3450 = vmatprep.subr.mxu1 %v3709_v12  ;;  %3418 = vmatpush3.msra.mxu0 %v449_v16  ;;  %v941_v16 = vsub.f32 %v939_v13, %v940_v14 }
 0x140   : > { %3451 = vmatpush3.msra.mxu1 %v984_v27  ;;  %3419 = vmatprep.subr.mxu0 %v3709_v12 }
 0x141   : > { %3452 = vmatprep.subr.mxu1 %v3709_v12  ;;  %3420 = vmatpush3.msra.mxu0 %v456_v28  ;;  %v942_v26 = vand.u32 4294901760, %v941_v16  ;;  %v4028_v28 = vsel %vm1399_vm3, %v3849_v21, 0 }
 0x142   : > { %3453 = vmatpush3.msra.mxu1 %v991_v36  ;;  %3421 = vmatprep.subr.mxu0 %v3709_v12  ;;  %v4038_v29 = vand.u32 4294901760, %v4028_v28 }
 0x143   : > { %3454 = vmatprep.subr.mxu1 %v3709_v12  ;;  %3422 = vmatpush3.msra.mxu0 %v463_v34 }
 0x144   : > { %3423 = vmatprep.mubr.msk.f32.mxu0 %vm3710_vm1, %v3709_v12  ;;  %3455 = vmatpush3.msra.mxu1 %v998_v15  ;;  %v4062_v27 = vsub.f32 %v4028_v28, %v4038_v29 }
 0x145   : > { %3456 = vmatprep.mubr.msk.f32.mxu1 %vm3710_vm1, %v3709_v12  ;;  %3424 = vmatmul.mubr.f32.vlgmr.msra.gmra.mxu0 %v3898_v55 }
 0x146   : > { %3437 = vmatprep.subr.mxu0 %v3709_v12  ;;  %3457 = vmatmul.mubr.f32.vlgmr.msra.gmra.mxu1 %v3967_v33  ;;  %v1480_v35 = vand.u32 4294901760, %v4062_v27 }
 0x147   : > { %3470 = vmatprep.subr.mxu1 %v3709_v12  ;;  %3438 = vmatpush3.msra.mxu0 %v3905_v58 }
 0x148   : > { %3471 = vmatpush3.msra.mxu1 %v3905_v58  ;;  %3439 = vmatprep.subr.mxu0 %v3709_v12  ;;  %v1481_v36 = vsub.f32 %v4062_v27, %v1480_v35 }
 0x149   : > { %3472 = vmatprep.subr.mxu1 %v3709_v12  ;;  %3440 = vmatpush3.msra.mxu0 %v3909_v60 }
 0x14a   : > { %3473 = vmatpush3.msra.mxu1 %v3909_v60  ;;  %3441 = vmatprep.subr.mxu0 %v3709_v12 }
 0x14b   : > { %3474 = vmatprep.subr.mxu1 %v3709_v12  ;;  %3442 = vmatpush3.msra.mxu0 %v3916_v0 }
 0x14c   : > { %3475 = vmatpush3.msra.mxu1 %v3916_v0  ;;  %3443 = vmatprep.subr.mxu0 %v3709_v12 }
 0x14d   : > { %3476 = vmatprep.subr.mxu1 %v3709_v12  ;;  %3444 = vmatpush3.msra.mxu0 %v3923_v3 }
 0x14e   : > { %3445 = vmatprep.mubr.msk.f32.mxu0 %vm3710_vm1, %v3709_v12  ;;  %3477 = vmatpush3.msra.mxu1 %v3923_v3 }
 0x14f   : > { %3478 = vmatprep.mubr.msk.f32.mxu1 %vm3710_vm1, %v3709_v12  ;;  %3446 = vmatmul.mubr.f32.vlgmr.msra.gmra.mxu0 %v942_v26 }
 0x150   : > { %3459 = vmatprep.subr.mxu0 %v3709_v12  ;;  %3479 = vmatmul.mubr.f32.vlgmr.msra.gmra.mxu1 %v940_v14 }
 0x151   : > { %3492 = vmatprep.subr.mxu1 %v3709_v12  ;;  %3460 = vmatpush3.msra.mxu0 %v3914_v63 }
 0x152   : > { %3493 = vmatpush3.msra.mxu1 %v3905_v58  ;;  %3461 = vmatprep.subr.mxu0 %v3709_v12 }
 0x153   : > { %3494 = vmatprep.subr.mxu1 %v3709_v12  ;;  %3462 = vmatpush3.msra.mxu0 %v3921_v2 }
 0x154   : > { %3495 = vmatpush3.msra.mxu1 %v3909_v60  ;;  %3463 = vmatprep.subr.mxu0 %v3709_v12 }
 0x155   : > { %3496 = vmatprep.subr.mxu1 %v3709_v12  ;;  %3464 = vmatpush3.msra.mxu0 %v3929_v8 }
 0x156   : > { %3497 = vmatpush3.msra.mxu1 %v3916_v0  ;;  %3465 = vmatprep.subr.mxu0 %v3709_v12  ;;  %v821_v0 = vstv %s239_s0 }
 0x157   : > { %3498 = vmatprep.subr.mxu1 %v3709_v12  ;;  %3466 = vmatpush3.msra.mxu0 %v3937_v18 }
 0x158   : > { %3467 = vmatprep.mubr.msk.f32.mxu0 %vm3710_vm1, %v3709_v12  ;;  %3499 = vmatpush3.msra.mxu1 %v3923_v3 }
 0x159   : > { %3500 = vmatprep.mubr.msk.f32.mxu1 %vm3710_vm1, %v3709_v12  ;;  %3468 = vmatmul.mubr.f32.vlgmr.msra.gmra.mxu0 %v939_v13  ;;  %v1482_v13 = vand.u32 4294901760, %v1481_v36 }
 0x15a   : > { %3481 = vmatprep.subr.mxu0 %v3709_v12  ;;  %3501 = vmatmul.mubr.f32.vlgmr.msra.gmra.mxu1 %v3967_v33 }
 0x15b   : > { %3482 = vmatpush3.msra.mxu0 %v975_v4  ;;  %3489 = vmatprep.mubr.msk.f32.mxu0 %vm3710_vm1, %v3709_v12 }
 0x15c   : > { %3483 = vmatprep.subr.mxu0 %v3709_v12  ;;  %3513 = vmatprep.mubr.f32.mxu1 %v4038_v29 }
 0x15d   : > { %3484 = vmatpush3.msra.mxu0 %v982_v17 }
 0x15e   : > { %3485 = vmatprep.subr.mxu0 %v3709_v12 }
 0x15f   : > { %3486 = vmatpush3.msra.mxu0 %v989_v11 }
 0x160   : > { %3487 = vmatprep.subr.mxu0 %v3709_v12  ;;  %v247_v12 = vand.u32 127, %v246_v43 }
 0x161   : > { %3488 = vmatpush3.msra.mxu0 %v996_v25 }
 0x162   : > { %3490 = vmatmul.mubr.f32.vlgmr.msra.gmra.mxu0 %v3967_v33  ;;  %vm251_vm4 = vcmp.lt.s32.totalorder %v247_v12, %v250_v48 }
 0x163   : > { %v252_v55 = vsel %vm251_vm4, 0.0, %v3711_v54  ;;  %3505 = vmatprep.mubr.f32.mxu0 %v1482_v13  ;;  %v1407_v54 = vsel %vm1399_vm3, %v3855_v23, 0 }
 0x1ea   : > { %v502_v21 = vpop.f32.mrf.mxu1 }
 0x1ec   : > { %v3392_v34 = vpop.f32.mrf.mxu1 }
 0x1f2   : > { %v659_v37 = vpop.f32.mrf.mxu1 }
 0x1f3   : > { %v411_v38 = vpop.f32.mrf.mxu0 }
 0x1f4   : > { %v3414_v39 = vpop.f32.mrf.mxu1  ;;  %v503_v45 = vadd.f32 %v502_v21, %v411_v38 }
 0x1f5   : > { %v3381_v40 = vpop.f32.mrf.mxu0 }
 0x1fb   : > { %v582_v41 = vpop.f32.mrf.mxu0 }
 0x1fc   : > { %v817_v42 = vpop.f32.mrf.mxu1  ;;  %v583_v47 = vadd.f32 %v582_v41, %v503_v45 }
 0x1fd   : > { %v3403_v44 = vpop.f32.mrf.mxu0 }
 0x1fe   : > { %v3436_v46 = vpop.f32.mrf.mxu1  ;;  %v660_v49 = vadd.f32 %v659_v37, %v583_v47 }
 0x205   : > { %v742_v50 = vpop.f32.mrf.mxu0 }
 0x206   : > { %v743_v51 = vadd.f32 %v742_v50, %v660_v49  ;;  %v1035_v52 = vpop.f32.mrf.mxu1 }
 0x207   : > { %v3425_v53 = vpop.f32.mrf.mxu0 }
 0x208   : > { %v818_v56 = vadd.f32 %v817_v42, %v743_v51  ;;  %v3458_v57 = vpop.f32.mrf.mxu1  ;;  %v1404_v53 = vsel %vm1399_vm3, %v3852_v22, 0 }
 0x209   : > { %v1410_v57 = vsel %vm1399_vm3, %v3858_v24, 0 }
 0x20a   : > { %v1384_v58 = vadd.f32 %v818_v56, %v252_v55  ;;  %v1488_v55 = vand.u32 4294901760, %v1404_v53 }
 0x20c   : > { %v1385_v59 = vsel %vm1361_vm0, %v1384_v58, -inf }
 0x20d   : > { %1386 = vmax.xlane.f32.xlu0 %v1385_v59  ;;  %v1508_v59 = vand.u32 4294901760, %v1410_v57 }
 0x20f   : > { %v944_v60 = vpop.f32.mrf.mxu0 }
 0x210   : > { %v1192_v61 = vpop.f32.mrf.mxu1  ;;  %v945_v1 = vadd.f32 %v944_v60, %v821_v0 }
 0x211   : > { %v3447_v62 = vpop.f32.mrf.mxu0 }
 0x212   : > { %v3480_v63 = vpop.f32.mrf.mxu1  ;;  %v1036_v4 = vadd.f32 %v1035_v52, %v945_v1  ;;  %v1509_v62 = vsub.f32 %v1410_v57, %v1508_v59 }
 0x214   : > { %v1510_v22 = vand.u32 4294901760, %v1509_v62 }
 0x216   : > { %v1511_v10 = vsub.f32 %v1509_v62, %v1510_v22 }
 0x219   : > { %v1115_v2 = vpop.f32.mrf.mxu0 }
 0x21a   : > { %v1350_v3 = vpop.f32.mrf.mxu1  ;;  %v1116_v18 = vadd.f32 %v1115_v2, %v1036_v4 }
 0x21b   : > { %v3469_v8 = vpop.f32.mrf.mxu0 }
 0x21c   : > { %v3502_v17 = vpop.f32.mrf.mxu1  ;;  %v1193_v11 = vadd.f32 %v1192_v61, %v1116_v18 }
 0x222   : > { %v1275_v20 = vpop.f32.mrf.mxu0 }
 0x223   : > { %v1276_v25 = vadd.f32 %v1275_v20, %v1193_v11  ;;  %v1512_v20 = vand.u32 4294901760, %v1511_v10 }
 0x224   : > { %v3491_v30 = vpop.f32.mrf.mxu0 }
 0x225   : > { %v1351_v32 = vadd.f32 %v1350_v3, %v1276_v25 }
 0x227   : > { %v1354_v33 = vadd.f32 %v1351_v32, %v255_v31 }
 0x229   : > { %1357 = vperm.xlu1 %3661, %v1354_v33  }
 0x296   : > { %v1387_v15 = vpop.xlane.xlu0 %1386 }
 0x297   : > { %v1388_v14 = vsub.f32 %v1384_v58, %v1387_v15  ;;  %v1489_v58 = vsub.f32 %v1404_v53, %v1488_v55 }
 0x299   : > { %v1389_v16 = vmul.f32 1.442695, %v1388_v14  ;;  %v1490_v0 = vand.u32 4294901760, %v1489_v58 }
 0x29b   : > { %3662 = vpow2.f32 %v1389_v16  ;;  %v1491_v4 = vsub.f32 %v1489_v58, %v1490_v0 }
 0x29d   : > { %v1492_v18 = vand.u32 4294901760, %v1491_v4 }
 0x2a4   : > { %v1358_v26 = vpop.permute.xlu1 %1357 }
 0x2a5   : > { %v1360_v21 = vadd.f32 %v1358_v26, %v818_v56  ;;  %v1498_v56 = vand.u32 4294901760, %v1407_v54 }
 0x2a7   : > { %v1362_v34 = vsel %vm1361_vm0, %v1360_v21, -inf  ;;  %v1499_v60 = vsub.f32 %v1407_v54, %v1498_v56 }
 0x2a8   : > { %v4069_v37 = vpop.eup %3662  ;;  %v1363_v28 = vrot.slane %v1362_v34, 4 }
 0x2a9   : > { %v1391_v38 = vsel %vm1361_vm0, %v4069_v37, 0.0  ;;  %v1500_v1 = vand.u32 4294901760, %v1499_v60 }
 0x2aa   : > { %v1364_v39 = vmax.f32 %v1362_v34, %v1363_v28  ;;  %1392 = vadd.xlane.f32.xlu0 %v1391_v38 }
 0x2ab   : > { %v1501_v8 = vsub.f32 %v1499_v60, %v1500_v1 }
 0x2ac   : > { %v1365_v40 = vrot.slane %v1364_v39, 2 }
 0x2ad   : > { %v1502_v19 = vand.u32 4294901760, %v1501_v8 }
 0x2ae   : > { %v1366_v41 = vmax.f32 %v1364_v39, %v1365_v40 }
 0x2b0   : > { %v1367_v42 = vrot.slane %v1366_v41, 1 }
 0x2b2   : > { %v1368_v43 = vmax.f32 %v1366_v41, %v1367_v42 }
 0x2b4   : > { %v1369_v44 = vsub.f32 %v1360_v21, %v1368_v43 }
 0x2b6   : > { %v1370_v45 = vmul.f32 1.442695, %v1369_v44 }
 0x2b8   : > { %3664 = vpow2.f32 %v1370_v45 }
 0x2c5   : > { %v3665_v46 = vpop.eup %3664 }
 0x2c6   : > { %v1372_v47 = vsel %vm1361_vm0, %v3665_v46, 0.0 }
 0x2c7   : > { %v1373_v12 = vrot.slane %v1372_v47, 4 }
 0x2c9   : > { %v1374_v48 = vadd.f32 %v1373_v12, %v1372_v47 }
 0x2cb   : > { %v1375_v49 = vrot.slane %v1374_v48, 2 }
 0x2cd   : > { %v1376_v50 = vadd.f32 %v1375_v49, %v1374_v48 }
 0x2cf   : > { %v1377_v51 = vrot.slane %v1376_v50, 1 }
 0x2d1   : > { %v1378_v52 = vadd.f32 %v1377_v51, %v1376_v50 }
 0x2d3   : > { %3666 = vrcp.f32 %v1378_v52 }
 0x2e0   : > { %v3667_v61 = vpop.eup %3666 }
 0x2e1   : > { %v1380_v63 = vmul.f32 %v3667_v61, %v1378_v52 }
 0x2e3   : > { %v1381_v2 = vsub.f32 2.0, %v1380_v63 }
 0x2e5   : > { %v1382_v3 = vmul.f32 %v3667_v61, %v1381_v2 }
 0x2e7   : > { %v1383_v17 = vmul.f32 %v3665_v46, %v1382_v3 }
 0x2e9   : > { %1987 = vxpose.xlu1.b32.start.end [1/1] (short) (narrow) %v1383_v17, 16  ;;  %v1443_v23 = vand.u32 4294901760, %v1383_v17 }
 0x2eb   : > { %3503 = vmatprep.subr.mxu0 %v1443_v23  ;;  %v1550_v24 = vsub.f32 %v1383_v17, %v1443_v23 }
 0x2ec   : > { %3504 = vmatpush3.msra.mxu0 %v1443_v23 }
 0x2ed   : > { %3506 = vmatmul.mubr.f32.vlgmr.msra.gmra.mxu0 %v1492_v18  ;;  %3519 = vmatprep.subr.mxu0 %v1550_v24  ;;  %v1551_v11 = vand.u32 4294901760, %v1550_v24 }
 0x2ee   : > { %3520 = vmatpush3.msra.mxu0 %v1550_v24  ;;  %3508 = vmatprep.mubr.f32.mxu0 %v1502_v19 }
 0x2ef   : > { %3535 = vmatprep.subr.mxu0 %v1551_v11  ;;  %v1552_v25 = vsub.f32 %v1550_v24, %v1551_v11 }
 0x2f1   : > { %3509 = vmatmul.mubr.f32.gmra.mxu0 %v1512_v20  ;;  %v1553_v30 = vand.u32 4294901760, %v1552_v25 }
 0x2f2   : > { %3521 = vmatprep.mubr.f32.mxu0 %v4062_v27 }
 0x2f3   : > { %3511 = vmatprep.subr.mxu1 %v1553_v30 }
 0x2f4   : > { %3512 = vmatpush3.msra.mxu1 %v1553_v30 }
 0x2f5   : > { %3514 = vmatmul.mubr.f32.vlgmr.msra.gmra.mxu1 %v1488_v55  ;;  %3522 = vmatmul.mubr.f32.vlgmr.msra.gmra.mxu0 %v1489_v58 }
 0x2f6   : > { %3527 = vmatprep.subr.mxu1 %v1443_v23  ;;  %3536 = vmatpush3.msra.mxu0 %v1551_v11  ;;  %v2515_v11 = vsel %vm1361_vm0, %v3791_v5, 0 }
 0x2f7   : > { %3528 = vmatpush3.msra.mxu1 %v1443_v23  ;;  %3516 = vmatprep.mubr.f32.mxu1 %v1498_v56  ;;  %v4090_v30 = vand.u32 4294901760, %v2515_v11 }
 0x2f8   : > { %3543 = vmatprep.subr.mxu1 %v1443_v23  ;;  %3524 = vmatprep.mubr.f32.mxu0 %v1499_v60 }
 0x2f9   : > { %3517 = vmatmul.mubr.f32.gmra.mxu1 %v1508_v59  ;;  %3525 = vmatmul.mubr.f32.gmra.mxu0 %v1509_v62 }
 0x2fa   : > { %3529 = vmatprep.mubr.f32.mxu1 %v1480_v35  ;;  %3537 = vmatprep.mubr.f32.mxu0 %v4038_v29 }
 0x2fd   : > { %3530 = vmatmul.mubr.f32.vlgmr.msra.gmra.mxu1 %v1490_v0  ;;  %3538 = vmatmul.mubr.f32.vlgmr.msra.gmra.mxu0 %v1488_v55 }
 0x2fe   : > { %3544 = vmatpush3.msra.mxu1 %v1443_v23  ;;  %3532 = vmatprep.mubr.f32.mxu1 %v1500_v1 }
 0x2ff   : > { %3540 = vmatprep.mubr.f32.mxu0 %v1498_v56 }
 0x301   : > { %3533 = vmatmul.mubr.f32.gmra.mxu1 %v1510_v22  ;;  %3541 = vmatmul.mubr.f32.gmra.mxu0 %v1508_v59 }
 0x302   : > { %3545 = vmatprep.mubr.f32.mxu1 %v4038_v29 }
 0x305   : > { %3546 = vmatmul.mubr.f32.vlgmr.msra.gmra.mxu1 %v1488_v55 }
 0x306   : > { %3548 = vmatprep.mubr.f32.mxu1 %v1498_v56 }
 0x309   : > { %3549 = vmatmul.mubr.f32.gmra.mxu1 %v1508_v59 }
 0x333   : > { %v1393_v31 = vpop.xlane.xlu0 %1392 }
 0x334   : > { %3668 = vrcp.f32 %v1393_v31 }
 0x341   : > { %v3669_v32 = vpop.eup %3668 }
 0x342   : > { %v1395_v33 = vmul.f32 %v3669_v32, %v1393_v31 }
 0x344   : > { %v1396_v27 = vsub.f32 2.0, %v1395_v33 }
 0x346   : > { %v1397_v35 = vmul.f32 %v3669_v32, %v1396_v27 }
 0x348   : > { %v1398_v36 = vmul.f32 %v4069_v37, %v1397_v35  ;;  %v4093_v35 = vsub.f32 %v2515_v11, %v4090_v30 }
 0x34a   : > { %v2056_v13 = vand.u32 4294901760, %v1398_v36 }
 0x34c   : > { %v2143_v15 = vsub.f32 %v1398_v36, %v2056_v13  ;;  %3551 = vmatprep.subr.mxu0 %v2056_v13 }
 0x34d   : > { %3552 = vmatpush3.msra.mxu0 %v2056_v13 }
 0x34e   : > { %3561 = vmatprep.subr.mxu0 %v2143_v15  ;;  %v2144_v14 = vand.u32 4294901760, %v2143_v15 }
 0x350   : > { %v2145_v16 = vsub.f32 %v2143_v15, %v2144_v14 }
 0x352   : > { %v2146_v26 = vand.u32 4294901760, %v2145_v16  ;;  %v2601_v16 = vand.u32 4294901760, %v4093_v35 }
 0x354   : > { %3556 = vmatprep.subr.mxu1 %v2146_v26 }
 0x355   : > { %3557 = vmatpush3.msra.mxu1 %v2146_v26 }
 0x356   : > { %3566 = vmatprep.subr.mxu1 %v2056_v13 }
 0x365   : > { %v2003_v29 = vpop.trf.xlu1 }
 0x366   : > { %v2020_v21 = vsel %vm1399_vm3, %v2003_v29, 0 }
 0x367   : > { %v2091_v34 = vand.u32 4294901760, %v2020_v21 }
 0x369   : > { %v2092_v28 = vsub.f32 %v2020_v21, %v2091_v34  ;;  %v2004_v38 = vpop.trf.xlu1  ;;  %3558 = vmatprep.mubr.f32.mxu1 %v2091_v34 }
 0x36a   : > { %v2023_v37 = vsel %vm1399_vm3, %v2004_v38, 0 }
 0x36b   : > { %v2101_v39 = vand.u32 4294901760, %v2023_v37  ;;  %v2093_v40 = vand.u32 4294901760, %v2092_v28 }
 0x36d   : > { %v2102_v41 = vsub.f32 %v2023_v37, %v2101_v39  ;;  %3559 = vmatmul.mubr.f32.vlgmr.msra.gmra.mxu1 %v2101_v39  ;;  %v2094_v42 = vsub.f32 %v2092_v28, %v2093_v40 }
 0x36e   : > { %3567 = vmatpush3.msra.mxu1 %v2056_v13  ;;  %3568 = vmatprep.mubr.f32.mxu1 %v2093_v40 }
 0x36f   : > { %v2103_v43 = vand.u32 4294901760, %v2102_v41  ;;  %3576 = vmatprep.subr.mxu1 %v2056_v13  ;;  %v2095_v44 = vand.u32 4294901760, %v2094_v42 }
 0x371   : > { %v2104_v45 = vsub.f32 %v2102_v41, %v2103_v43  ;;  %3553 = vmatprep.mubr.f32.mxu0 %v2095_v44  ;;  %3569 = vmatmul.mubr.f32.vlgmr.msra.gmra.mxu1 %v2103_v43 }
 0x372   : > { %3577 = vmatpush3.msra.mxu1 %v2056_v13  ;;  %3578 = vmatprep.mubr.f32.mxu1 %v2091_v34 }
 0x373   : > { %v2105_v46 = vand.u32 4294901760, %v2104_v45  ;;  %v2518_v45 = vsel %vm1361_vm0, %v3793_v6, 0 }
 0x375   : > { %3554 = vmatmul.mubr.f32.vlgmr.msra.gmra.mxu0 %v2105_v46  ;;  %3579 = vmatmul.mubr.f32.vlgmr.msra.gmra.mxu1 %v2101_v39 }
 0x376   : > { %3562 = vmatpush3.msra.mxu0 %v2143_v15  ;;  %3563 = vmatprep.mubr.f32.mxu0 %v2092_v28 }
 0x377   : > { %3571 = vmatprep.subr.mxu0 %v2144_v14  ;;  %3595 = vmatprep.mubr.f32.mxu1 %v4090_v30 }
 0x379   : > { %3564 = vmatmul.mubr.f32.vlgmr.msra.gmra.mxu0 %v2102_v41 }
 0x37a   : > { %3572 = vmatpush3.msra.mxu0 %v2144_v14  ;;  %3573 = vmatprep.mubr.f32.mxu0 %v2091_v34  ;;  %v2602_v34 = vsub.f32 %v4093_v35, %v2601_v16 }
 0x37d   : > { %3574 = vmatmul.mubr.f32.vlgmr.msra.gmra.mxu0 %v2101_v39  ;;  %v2603_v39 = vand.u32 4294901760, %v2602_v34 }
 0x37f   : > { %3585 = vmatprep.mubr.f32.mxu0 %v2603_v39 }
 0x3ad   : > { %v3507_v47 = vpop.f32.mrf.mxu0 }
 0x3af   : > { %v1484_v12 = vpop.f32.mrf.mxu0 }
 0x3b1   : > { %v3510_v48 = vpop.f32.mrf.mxu0 }
 0x3b3   : > { %v1504_v49 = vpop.f32.mrf.mxu0 }
 0x3b5   : > { %v3515_v50 = vpop.f32.mrf.mxu1  ;;  %v3523_v51 = vpop.f32.mrf.mxu0 }
 0x3b6   : > { %v1597_v52 = vadd.f32 %v3515_v50, %v3507_v47  ;;  %v2521_v50 = vsel %vm1361_vm0, %v3795_v7, 0 }
 0x3b7   : > { %v1590_v53 = vpop.f32.mrf.mxu1  ;;  %v1682_v54 = vpop.f32.mrf.mxu0 }
 0x3b8   : > { %v1591_v55 = vadd.f32 %v1590_v53, %v1484_v12  ;;  %v1690_v59 = vadd.f32 %v3523_v51, %v1597_v52  ;;  %v2524_v53 = vsel %vm1361_vm0, %v3800_v9, 0 }
 0x3b9   : > { %v3518_v56 = vpop.f32.mrf.mxu1  ;;  %v3526_v57 = vpop.f32.mrf.mxu0 }
 0x3ba   : > { %v1609_v58 = vadd.f32 %v3518_v56, %v3510_v48  ;;  %v1683_v63 = vadd.f32 %v1682_v54, %v1591_v55 }
 0x3bb   : > { %v1602_v60 = vpop.f32.mrf.mxu1  ;;  %v1696_v61 = vpop.f32.mrf.mxu0 }
 0x3bc   : > { %v1603_v62 = vadd.f32 %v1602_v60, %v1504_v49  ;;  %v1704_v3 = vadd.f32 %v3526_v57, %v1609_v58  ;;  %v4122_v49 = vand.u32 4294901760, %v2518_v45  ;;  %v4128_v57 = vand.u32 4294901760, %v2521_v50 }
 0x3bd   : > { %v3531_v0 = vpop.f32.mrf.mxu1  ;;  %v3539_v1 = vpop.f32.mrf.mxu0 }
 0x3be   : > { %v1786_v2 = vadd.f32 %v3531_v0, %v1690_v59  ;;  %v1697_v17 = vadd.f32 %v1696_v61, %v1603_v62  ;;  %v4131_v60 = vsub.f32 %v2518_v45, %v4122_v49  ;;  %v4133_v61 = vand.u32 4294901760, %v2524_v53 }
 0x3bf   : > { %v1777_v4 = vpop.f32.mrf.mxu1  ;;  %v1875_v22 = vpop.f32.mrf.mxu0 }
 0x3c0   : > { %v1778_v8 = vadd.f32 %v1777_v4, %v1683_v63  ;;  %v1882_v19 = vadd.f32 %v3539_v1, %v1786_v2 }
 0x3c1   : > { %v3534_v23 = vpop.f32.mrf.mxu1  ;;  %v3542_v18 = vpop.f32.mrf.mxu0 }
 0x3c2   : > { %v1802_v10 = vadd.f32 %v3534_v23, %v1704_v3  ;;  %v1876_v25 = vadd.f32 %v1875_v22, %v1778_v8  ;;  %v2620_v3 = vsub.f32 %v2521_v50, %v4128_v57  ;;  %v2611_v22 = vand.u32 4294901760, %v4131_v60 }
 0x3c3   : > { %v1793_v24 = vpop.f32.mrf.mxu1  ;;  %v1887_v32 = vpop.f32.mrf.mxu0  ;;  %v2630_v8 = vsub.f32 %v2524_v53, %v4133_v61 }
 0x3c4   : > { %v1794_v20 = vadd.f32 %v1793_v24, %v1697_v17  ;;  %v1894_v27 = vadd.f32 %v3542_v18, %v1802_v10 }
 0x3c5   : > { %v3547_v31 = vpop.f32.mrf.mxu1 }
 0x3c6   : > { %v1972_v33 = vadd.f32 %v3547_v31, %v1882_v19  ;;  %v1888_v14 = vadd.f32 %v1887_v32, %v1794_v20  ;;  %v2621_v19 = vand.u32 4294901760, %v2620_v3  ;;  %v2612_v20 = vsub.f32 %v4131_v60, %v2611_v22 }
 0x3c7   : > { %v1965_v36 = vpop.f32.mrf.mxu1 }
 0x3c8   : > { %3125 = vst.msk [vmem:[%s3789_s22 + $0x28] sm:$0xff] %vm1361_vm0, %v1972_v33  ;;  %v3129_v13 = vmul.f32 %v1972_v33, %v3793_v6  ;;  %v1966_v15 = vadd.f32 %v1965_v36, %v1876_v25  ;;  %v2631_v25 = vand.u32 4294901760, %v2630_v8  ;;  %v2622_v33 = vsub.f32 %v2620_v3, %v2621_v19 }
 0x3c9   : > { %v3550_v26 = vpop.f32.mrf.mxu1  ;;  %v2613_v36 = vand.u32 4294901760, %v2612_v20 }
 0x3ca   : > { %3133 = vst.msk [vmem:[%s3789_s22 + $0x48] sm:$0xff] %vm1361_vm0, %v3129_v13  ;;  %3124 = vst.msk [vmem:[%s3789_s22 + $0x20] sm:$0xff] %vm1361_vm0, %v1966_v15  ;;  %v3128_v29 = vmul.f32 %v1966_v15, %v3791_v5  ;;  %v1984_v21 = vadd.f32 %v3550_v26, %v1894_v27  ;;  %v2632_v15 = vsub.f32 %v2630_v8, %v2631_v25 }
 0x3cb   : > { %v1977_v28 = vpop.f32.mrf.mxu1 }
 0x3cc   : > { %3132 = vst.msk [vmem:[%s3789_s22 + $0x40] sm:$0xff] %vm1361_vm0, %v3128_v29  ;;  %3127 = vst.msk [vmem:[%s3789_s22 + $0x38] sm:$0xff] %vm1361_vm0, %v1984_v21  ;;  %v3131_v38 = vmul.f32 %v1984_v21, %v3800_v9  ;;  %v1978_v37 = vadd.f32 %v1977_v28, %v1888_v14  ;;  %v2623_v29 = vand.u32 4294901760, %v2622_v33  ;;  %v2633_v34 = vand.u32 4294901760, %v2632_v15 }
 0x3ce   : > { %3135 = vst.msk [vmem:[%s3789_s22 + $0x58] sm:$0xff] %vm1361_vm0, %v3131_v38  ;;  %3126 = vst.msk [vmem:[%s3789_s22 + $0x30] sm:$0xff] %vm1361_vm0, %v1978_v37  ;;  %v3130_v40 = vmul.f32 %v1978_v37, %v3795_v7 }
 0x3d0   : > { %3134 = vst.msk [vmem:[%s3789_s22 + $0x50] sm:$0xff] %vm1361_vm0, %v3130_v40 }
 0x42d   : > { %v3560_v41 = vpop.f32.mrf.mxu1 }
 0x42f   : > { %v2183_v42 = vpop.f32.mrf.mxu1 }
 0x431   : > { %v3570_v43 = vpop.f32.mrf.mxu1 }
 0x433   : > { %v2344_v12 = vpop.f32.mrf.mxu1 }
 0x435   : > { %v3555_v44 = vpop.f32.mrf.mxu0  ;;  %v3580_v58 = vpop.f32.mrf.mxu1 }
 0x436   : > { %v2190_v47 = vadd.f32 %v3560_v41, %v3555_v44 }
 0x437   : > { %v2097_v46 = vpop.f32.mrf.mxu0  ;;  %v2504_v4 = vpop.f32.mrf.mxu1 }
 0x438   : > { %v2184_v51 = vadd.f32 %v2183_v42, %v2097_v46 }
 0x439   : > { %v3565_v48 = vpop.f32.mrf.mxu0 }
 0x43a   : > { %v2271_v52 = vadd.f32 %v3565_v48, %v2190_v47 }
 0x43b   : > { %v2263_v54 = vpop.f32.mrf.mxu0 }
 0x43c   : > { %v2264_v55 = vadd.f32 %v2263_v54, %v2184_v51  ;;  %v2353_v56 = vadd.f32 %v3570_v43, %v2271_v52 }
 0x43d   : > { %v3575_v59 = vpop.f32.mrf.mxu0 }
 0x43e   : > { %v2433_v62 = vadd.f32 %v3575_v59, %v2353_v56  ;;  %v2345_v63 = vadd.f32 %v2344_v12, %v2264_v55 }
 0x43f   : > { %v2426_v0 = vpop.f32.mrf.mxu0 }
 0x440   : > { %v2511_v1 = vadd.f32 %v3580_v58, %v2433_v62  ;;  %v2427_v2 = vadd.f32 %v2426_v0, %v2345_v63 }
 0x442   : > { %v2530_v17 = vsel %vm1361_vm0, %v2511_v1, 0  ;;  %v2505_v23 = vadd.f32 %v2504_v4, %v2427_v2 }
 0x443   : > { %v2561_v18 = vand.u32 4294901760, %v2530_v17 }
 0x444   : > { %v2527_v10 = vsel %vm1361_vm0, %v2505_v23, 0 }
 0x445   : > { %v2669_v24 = vsub.f32 %v2530_v17, %v2561_v18  ;;  %v2564_v11 = vand.u32 4294901760, %v2527_v10  ;;  %3581 = vmatprep.subr.mxu0 %v2561_v18 }
 0x446   : > { %3582 = vmatpush3.xpose.msra.mxu0 %v2561_v18 }
 0x447   : > { %v2676_v31 = vsub.f32 %v2527_v10, %v2564_v11  ;;  %3583 = vmatprep.subr.mxu0 %v2564_v11  ;;  %v2670_v32 = vand.u32 4294901760, %v2669_v24 }
 0x449   : > { %v2671_v27 = vsub.f32 %v2669_v24, %v2670_v32  ;;  %v2677_v13 = vand.u32 4294901760, %v2676_v31 }
 0x44a   : > { %3584 = vmatpush3.xpose.msra.mxu0 %v2564_v11 }
 0x44b   : > { %3601 = vmatprep.subr.mxu0 %v2669_v24  ;;  %v2672_v14 = vand.u32 4294901760, %v2671_v27  ;;  %v2678_v26 = vsub.f32 %v2676_v31, %v2677_v13 }
 0x44d   : > { %3591 = vmatprep.subr.mxu1 %v2672_v14  ;;  %3586 = vmatmul.mubr.f32.vlgmr.msra.gmra.mxu0 %v2613_v36  ;;  %v2679_v21 = vand.u32 4294901760, %v2678_v26 }
 0x44e   : > { %3592 = vmatpush3.xpose.msra.mxu1 %v2672_v14  ;;  %3602 = vmatpush3.xpose.msra.mxu0 %v2669_v24 }
 0x44f   : > { %3593 = vmatprep.subr.mxu1 %v2679_v21  ;;  %3603 = vmatprep.subr.mxu0 %v2676_v31 }
 0x450   : > { %3588 = vmatprep.mubr.f32.mxu0 %v2623_v29 }
 0x451   : > { %3589 = vmatmul.mubr.f32.gmra.mxu0 %v2633_v34 }
 0x452   : > { %3594 = vmatpush3.xpose.msra.mxu1 %v2679_v21  ;;  %3604 = vmatpush3.xpose.msra.mxu0 %v2676_v31 }
 0x453   : > { %3611 = vmatprep.subr.mxu1 %v2561_v18  ;;  %3621 = vmatprep.subr.mxu0 %v2670_v32 }
 0x454   : > { %3605 = vmatprep.mubr.f32.mxu0 %v4093_v35 }
 0x455   : > { %3596 = vmatmul.mubr.f32.vlgmr.msra.gmra.mxu1 %v4122_v49  ;;  %3606 = vmatmul.mubr.f32.vlgmr.msra.gmra.mxu0 %v4131_v60 }
 0x456   : > { %3612 = vmatpush3.xpose.msra.mxu1 %v2561_v18  ;;  %3622 = vmatpush3.xpose.msra.mxu0 %v2670_v32 }
 0x457   : > { %3613 = vmatprep.subr.mxu1 %v2564_v11  ;;  %3623 = vmatprep.subr.mxu0 %v2677_v13 }
 0x458   : > { %3598 = vmatprep.mubr.f32.mxu1 %v4128_v57  ;;  %3608 = vmatprep.mubr.f32.mxu0 %v2620_v3 }
 0x459   : > { %3599 = vmatmul.mubr.f32.gmra.mxu1 %v4133_v61  ;;  %3609 = vmatmul.mubr.f32.gmra.mxu0 %v2630_v8 }
 0x45a   : > { %3614 = vmatpush3.xpose.msra.mxu1 %v2564_v11  ;;  %3624 = vmatpush3.xpose.msra.mxu0 %v2677_v13 }
 0x45b   : > { %3631 = vmatprep.subr.mxu1 %v2561_v18  ;;  %3615 = vmatprep.mubr.f32.mxu1 %v2601_v16 }
 0x45c   : > { %3625 = vmatprep.mubr.f32.mxu0 %v4090_v30 }
 0x45d   : > { %3616 = vmatmul.mubr.f32.vlgmr.msra.gmra.mxu1 %v2611_v22  ;;  %3626 = vmatmul.mubr.f32.vlgmr.msra.gmra.mxu0 %v4122_v49 }
 0x45e   : > { %3632 = vmatpush3.xpose.msra.mxu1 %v2561_v18  ;;  %3618 = vmatprep.mubr.f32.mxu1 %v2621_v19 }
 0x45f   : > { %3633 = vmatprep.subr.mxu1 %v2564_v11  ;;  %3628 = vmatprep.mubr.f32.mxu0 %v4128_v57 }
 0x461   : > { %3619 = vmatmul.mubr.f32.gmra.mxu1 %v2631_v25  ;;  %3629 = vmatmul.mubr.f32.gmra.mxu0 %v4133_v61 }
 0x462   : > { %3634 = vmatpush3.xpose.msra.mxu1 %v2564_v11  ;;  %3635 = vmatprep.mubr.f32.mxu1 %v4090_v30 }
 0x465   : > { %3636 = vmatmul.mubr.f32.vlgmr.msra.gmra.mxu1 %v4122_v49 }
 0x466   : > { %3638 = vmatprep.mubr.f32.mxu1 %v4128_v57 }
 0x469   : > { %3639 = vmatmul.mubr.f32.gmra.mxu1 %v4133_v61 }
 0x50d   : > { %v3587_v35 = vpop.f32.mrf.mxu0 }
 0x50f   : > { %v2605_v16 = vpop.f32.mrf.mxu0 }
 0x511   : > { %v3590_v28 = vpop.f32.mrf.mxu0 }
 0x513   : > { %v2625_v38 = vpop.f32.mrf.mxu0 }
 0x515   : > { %v3597_v37 = vpop.f32.mrf.mxu1  ;;  %v3607_v39 = vpop.f32.mrf.mxu0 }
 0x516   : > { %v2723_v44 = vadd.f32 %v3597_v37, %v3587_v35 }
 0x517   : > { %v2716_v40 = vpop.f32.mrf.mxu1  ;;  %v2810_v41 = vpop.f32.mrf.mxu0 }
 0x518   : > { %v2717_v30 = vadd.f32 %v2716_v40, %v2605_v16  ;;  %v2818_v48 = vadd.f32 %v3607_v39, %v2723_v44 }
 0x519   : > { %v3600_v42 = vpop.f32.mrf.mxu1  ;;  %v3610_v43 = vpop.f32.mrf.mxu0 }
 0x51a   : > { %v2735_v49 = vadd.f32 %v3600_v42, %v3590_v28  ;;  %v2811_v52 = vadd.f32 %v2810_v41, %v2717_v30 }
 0x51b   : > { %v2728_v45 = vpop.f32.mrf.mxu1  ;;  %v2824_v46 = vpop.f32.mrf.mxu0 }
 0x51c   : > { %v2729_v53 = vadd.f32 %v2728_v45, %v2625_v38  ;;  %v2832_v56 = vadd.f32 %v3610_v43, %v2735_v49 }
 0x51d   : > { %v3617_v47 = vpop.f32.mrf.mxu1  ;;  %v3627_v12 = vpop.f32.mrf.mxu0 }
 0x51e   : > { %v2915_v54 = vadd.f32 %v3617_v47, %v2818_v48  ;;  %v2825_v60 = vadd.f32 %v2824_v46, %v2729_v53 }
 0x51f   : > { %v2906_v50 = vpop.f32.mrf.mxu1  ;;  %v3007_v51 = vpop.f32.mrf.mxu0 }
 0x520   : > { %v2907_v57 = vadd.f32 %v2906_v50, %v2811_v52  ;;  %v3014_v61 = vadd.f32 %v3627_v12, %v2915_v54 }
 0x521   : > { %v3620_v55 = vpop.f32.mrf.mxu1  ;;  %v3630_v59 = vpop.f32.mrf.mxu0 }
 0x522   : > { %v2931_v62 = vadd.f32 %v3620_v55, %v2832_v56  ;;  %v3008_v0 = vadd.f32 %v3007_v51, %v2907_v57 }
 0x523   : > { %v2922_v58 = vpop.f32.mrf.mxu1  ;;  %v3019_v3 = vpop.f32.mrf.mxu0 }
 0x524   : > { %v2923_v1 = vadd.f32 %v2922_v58, %v2825_v60  ;;  %v3026_v22 = vadd.f32 %v3630_v59, %v2931_v62 }
 0x525   : > { %v3637_v63 = vpop.f32.mrf.mxu1 }
 0x526   : > { %v3105_v2 = vadd.f32 %v3637_v63, %v3014_v61  ;;  %v3020_v18 = vadd.f32 %v3019_v3, %v2923_v1 }
 0x527   : > { %v3098_v4 = vpop.f32.mrf.mxu1 }
 0x528   : > { %v3137_v8 = vmul.f32 %v3105_v2, %v3793_v6  ;;  %v3099_v17 = vadd.f32 %v3098_v4, %v3008_v0 }
 0x529   : > { %v3640_v23 = vpop.f32.mrf.mxu1 }
 0x52a   : > { %3141 = vst.msk [vmem:[%s3789_s22 + $0x68] sm:$0xff] %vm1361_vm0, %v3137_v8  ;;  %v3136_v10 = vmul.f32 %v3099_v17, %v3791_v5  ;;  %v3117_v19 = vadd.f32 %v3640_v23, %v3026_v22 }
 0x52b   : > { %v3110_v24 = vpop.f32.mrf.mxu1 }
 0x52c   : > { %3140 = vst.msk [vmem:[%s3789_s22 + $0x60] sm:$0xff] %vm1361_vm0, %v3136_v10  ;;  %v3139_v11 = vmul.f32 %v3117_v19, %v3800_v9  ;;  %v3111_v20 = vadd.f32 %v3110_v24, %v3020_v18 }
 0x52e   : > { %3143 = vst.msk [vmem:[%s3789_s22 + $0x78] sm:$0xff] %vm1361_vm0, %v3139_v11  ;;  %v3138_v25 = vmul.f32 %v3111_v20, %v3795_v7 }
 0x530   : > { %3142 = vst.msk [vmem:[%s3789_s22 + $0x70] sm:$0xff] %vm1361_vm0, %v3138_v25 }
 0x531 PF: > { %s27_s7 = sadd.s32 1, %s3702_s7  }
 0x532   : > { %p24_p0 = scmp.ge.s32.totalorder %s27_s7, 4  }
 0x534   :  { %26 = sbr.rel (!%p24_p0) target bundleno = 26 (0x1a), region = 69 }

</bundles_post_ra>
